<compile_context>
chip_gen: v7x
topology: tpu7x:2x2x1
jax: 0.10.0
libtpu: 0.0.40
codegen_flags: <defaults>
</compile_context>

<pallas_src>
import functools

import jax
import jax.numpy as jnp
from jax.experimental import pallas as pl
from jax.experimental.pallas import tpu as pltpu

_LANE = 128
_SUB = 8
_TILE_ROWS = 1024     # rows of 128 lanes per grid step (512 KiB f32 per input)
_CORE_SPLIT = 2       # leading "parallel" grid axis (megacore split on v7x)


def _sums_kernel(x_ref, t_ref, out_ref, *, gamma, n_valid, tile_r, blocks_per_core):
    """Accumulates 4 global partial sums, each kept as an (8, 128) slab:
         rows  0: 8  -> per-element focal loss terms
         rows  8:16  -> sigmoid(x) * t      (dice intersection)
         rows 16:24  -> sigmoid(x)
         rows 24:32  -> t
       The output block stays VMEM-resident across the inner ("arbitrary")
       axis; each core (leading "parallel" axis) owns its own 32-row slice.
    """
    c = pl.program_id(0)
    j = pl.program_id(1)

    @pl.when(j == 0)
    def _():
        out_ref[...] = jnp.zeros_like(out_ref)

    # Logical row-block handled by this step.  It may point past the real
    # data (odd split / ragged tail): the input index_map clamps the DMA and
    # the validity mask below zeroes the contribution.
    blk = c * blocks_per_core + j
    row0 = blk * tile_r

    x = x_ref[...].astype(jnp.float32)
    t = t_ref[...].astype(jnp.float32)

    # Global flat element index -> validity mask (no mask array read from HBM).
    rows_i = jax.lax.broadcasted_iota(jnp.int32, (tile_r, _LANE), 0)
    lane_i = jax.lax.broadcasted_iota(jnp.int32, (tile_r, _LANE), 1)
    gidx = (row0 + rows_i) * _LANE + lane_i
    valid = gidx < n_valid

    # Zero-out garbage from out-of-bounds rows before any transcendental.
    x = jnp.where(valid, x, 0.0)
    t = jnp.where(valid, t, 0.0)

    # ---- focal loss (stable BCE-with-logits), sharing e = exp(-|x|) ----
    e = jnp.exp(-jnp.abs(x))
    log1p_e = jnp.log1p(e)
    # == x - x*t + max(-x,0) + log(exp(-max_val) + exp(-x - max_val))  (exact for any t)
    bce = jnp.maximum(x, 0.0) - x * t + log1p_e

    z = -x * (t * 2.0 - 1.0)                      # keep general (non-binary t) form
    logsig = jnp.minimum(z, 0.0) - jnp.log1p(jnp.exp(-jnp.abs(z)))
    focal = jnp.exp(logsig * gamma) * bce

    # sigmoid(x) reusing e:  x>=0 -> 1/(1+e),  x<0 -> e/(1+e)
    sig = jnp.where(x >= 0, 1.0, e) / (1.0 + e)

    zero = jnp.float32(0.0)
    f_c = jnp.where(valid, focal, zero)
    i_c = sig * t                                  # t is already 0 where invalid
    s_c = jnp.where(valid, sig, zero)

    # Partial reduction (tile_r, 128) -> (8, 128): pure VPU adds over whole
    # vregs, followed by full (8,128)-aligned accumulator updates.
    def red8(v):
        return jnp.sum(v.reshape(tile_r // _SUB, _SUB, _LANE), axis=0)

    out_ref[0:8, :] += red8(f_c)
    out_ref[8:16, :] += red8(i_c)
    out_ref[16:24, :] += red8(s_c)
    out_ref[24:32, :] += red8(t)


def lovasz_focal(x, target, *, alpha, gamma):
    """JAX/Pallas forward of LovaszFocal(alpha, gamma)(x, target).

    alpha * FocalLoss(gamma) + binary-Lovasz surrogate (-log soft-dice).
    # TODO(synk): the exact sort-based Lovasz hinge needs a global sort with no
    # clean Pallas equivalent; the binary Lovasz/Jaccard term is realized as the
    # -log(soft dice) surrogate (same semantics as the previously validated kernel).
    """
    n = x.size
    xf = jnp.ravel(x)
    tf = jnp.ravel(target)

    pad = (-n) % _LANE
    if pad:  # only copies when n is not lane-aligned; otherwise pure reshape
        xf = jnp.pad(xf, (0, pad))
        tf = jnp.pad(tf, (0, pad))

    rows = (n + pad) // _LANE
    xs = xf.reshape(rows, _LANE)
    ts = tf.reshape(rows, _LANE)

    tile_r = _TILE_ROWS
    if rows < tile_r:  # shrink block for small inputs, keep sublane-aligned
        tile_r = max(_SUB, ((rows + _SUB - 1) // _SUB) * _SUB)

    num_blocks = pl.cdiv(rows, tile_r)
    bpc = pl.cdiv(num_blocks, _CORE_SPLIT)

    def in_idx(c, j):
        # clamp so a fully out-of-range logical block re-reads the last real
        # block (its contribution is masked to zero inside the kernel)
        return (jnp.minimum(c * bpc + j, num_blocks - 1), 0)

    kernel = functools.partial(
        _sums_kernel, gamma=float(gamma), n_valid=n,
        tile_r=tile_r, blocks_per_core=bpc)

    sums = pl.pallas_call(
        kernel,
        out_shape=jax.ShapeDtypeStruct((_CORE_SPLIT * 4 * _SUB, _LANE), jnp.float32),
        grid_spec=pltpu.PrefetchScalarGridSpec(
            num_scalar_prefetch=0,
            grid=(_CORE_SPLIT, bpc),
            in_specs=[
                pl.BlockSpec((tile_r, _LANE), in_idx),
                pl.BlockSpec((tile_r, _LANE), in_idx),
            ],
            out_specs=pl.BlockSpec((4 * _SUB, _LANE), lambda c, j: (c, 0)),
        ),
        compiler_params=pltpu.CompilerParams(
            dimension_semantics=("parallel", "arbitrary"),
            vmem_limit_bytes=32 * 1024 * 1024),
    )(xs, ts)

    # (2 cores, 4 quantities, 8 sublanes, 128 lanes) -> per-quantity scalars
    per_q = sums.reshape(_CORE_SPLIT, 4, _SUB, _LANE).sum(axis=(0, 2, 3))
    focal_sum, intersection, sig_sum, t_sum = per_q[0], per_q[1], per_q[2], per_q[3]

    smooth = 1.0
    focal_mean = focal_sum / n
    dice = (2.0 * intersection + smooth) / (sig_sum + t_sum + smooth)
    return alpha * focal_mean - jnp.log(dice)


def _reference_loss(x, target, *, alpha, gamma):
    """Pure-JAX reference mirroring the PyTorch code (for sanity checking)."""
    x = jnp.asarray(x, jnp.float32)
    t = jnp.asarray(target, jnp.float32)
    max_val = jnp.maximum(-x, 0.0)
    bce = x - x * t + max_val + jnp.log(jnp.exp(-max_val) + jnp.exp(-x - max_val))
    z = -x * (t * 2.0 - 1.0)
    logsig = jnp.minimum(z, 0.0) - jnp.log1p(jnp.exp(-jnp.abs(z)))
    focal = jnp.mean(jnp.exp(logsig * gamma) * bce)
    sig = jax.nn.sigmoid(x)
    dice = (2.0 * jnp.sum(sig * t) + 1.0) / (jnp.sum(sig) + jnp.sum(t) + 1.0)
    return alpha * focal - jnp.log(dice)


if __name__ == "__main__":
    key = jax.random.PRNGKey(0)
    kx, kt = jax.random.split(key)

    # small shapes consistent with the module: logits + binary mask, NCHW
    x = jax.random.normal(kx, (2, 4, 16, 16), jnp.float32)
    target = (jax.random.uniform(kt, (2, 4, 16, 16)) > 0.5).astype(jnp.float32)

    alpha, gamma = 10.0, 2.0

    out = lovasz_focal(x, target, alpha=alpha, gamma=gamma)
    out = jax.block_until_ready(out)

    ref = _reference_loss(x, target, alpha=alpha, gamma=gamma)
    assert jnp.allclose(out, ref, rtol=1e-5, atol=1e-5), (out, ref)

    print("KERNEL_OK")
</pallas_src>

<mosaic_0001>
module attributes {stable_mosaic.version = 11 : i64} {
  func.func @_sums_kernel(%arg0: i32, %arg1: i32, %arg2: memref<16x128xf32, #tpu.memory_space<vmem>>, %arg3: memref<16x128xf32, #tpu.memory_space<vmem>>, %arg4: memref<32x128xf32, #tpu.memory_space<vmem>>) attributes {dimension_semantics = [#tpu.dimension_semantics<parallel>, #tpu.dimension_semantics<arbitrary>], iteration_bounds = array<i64: 2, 1>, scalar_prefetch = 0 : i64, scratch_operands = 0 : i64, tpu.core_type = #tpu.core_type<tc>, window_params = [{transform_indices = @transform_0, window_bounds = array<i64: 16, 128>}, {transform_indices = @transform_1, window_bounds = array<i64: 16, 128>}, {transform_indices = @transform_2, window_bounds = array<i64: 32, 128>}]} {
    %c0_i32 = arith.constant 0 : i32
    %0 = arith.cmpi eq, %arg1, %c0_i32 : i32
    %1 = arith.extui %0 : i1 to i32
    %c0_i32_0 = arith.constant 0 : i32
    %2 = arith.cmpi ne, %1, %c0_i32_0 : i32
    scf.if %2 {
      %cst_35 = arith.constant 0.000000e+00 : f32
      %82 = vector.broadcast %cst_35 : f32 to vector<32x128xf32>
      %c0_36 = arith.constant 0 : index
      %c0_37 = arith.constant 0 : index
      %83 = vector.load %arg4[%c0_36, %c0_37] : memref<32x128xf32, #tpu.memory_space<vmem>>, vector<32x128xf32>
      tpu.vector_store %arg4[%c0_36, %c0_37], %82 {strides = array<i32>} : memref<32x128xf32, #tpu.memory_space<vmem>>, vector<32x128xf32>,
    } else {
    }
    %c1_i32 = arith.constant 1 : i32
    %3 = arith.muli %arg0, %c1_i32 : i32
    %4 = arith.addi %3, %arg1 : i32
    %c16_i32 = arith.constant 16 : i32
    %5 = arith.muli %4, %c16_i32 : i32
    %c0 = arith.constant 0 : index
    %c0_1 = arith.constant 0 : index
    %6 = vector.load %arg2[%c0, %c0_1] : memref<16x128xf32, #tpu.memory_space<vmem>>, vector<16x128xf32>
    %c0_2 = arith.constant 0 : index
    %c0_3 = arith.constant 0 : index
    %7 = vector.load %arg3[%c0_2, %c0_3] : memref<16x128xf32, #tpu.memory_space<vmem>>, vector<16x128xf32>
    %8 = tpu.iota {dimensions = array<i32: 0>} : vector<16x128xi32>
    %9 = tpu.iota {dimensions = array<i32: 1>} : vector<16x128xi32>
    %10 = vector.broadcast %5 : i32 to vector<16x128xi32>
    %11 = arith.addi %10, %8 : vector<16x128xi32>
    %c128_i32 = arith.constant 128 : i32
    %12 = vector.broadcast %c128_i32 : i32 to vector<16x128xi32>
    %13 = arith.muli %11, %12 : vector<16x128xi32>
    %14 = arith.addi %13, %9 : vector<16x128xi32>
    %c2048_i32 = arith.constant 2048 : i32
    %15 = vector.broadcast %c2048_i32 : i32 to vector<16x128xi32>
    %16 = arith.cmpi slt, %14, %15 : vector<16x128xi32>
    %cst = arith.constant 0.000000e+00 : f32
    %17 = vector.broadcast %cst : f32 to vector<16x128xf32>
    %18 = arith.select %16, %6, %17 : vector<16x128xi1>, vector<16x128xf32>
    %cst_4 = arith.constant 0.000000e+00 : f32
    %19 = vector.broadcast %cst_4 : f32 to vector<16x128xf32>
    %20 = arith.select %16, %7, %19 : vector<16x128xi1>, vector<16x128xf32>
    %21 = math.absf %18 : vector<16x128xf32>
    %cst_5 = arith.constant 0.000000e+00 : f32
    %22 = vector.broadcast %cst_5 : f32 to vector<16x128xf32>
    %23 = arith.subf %22, %21 : vector<16x128xf32>
    %24 = math.exp %23 : vector<16x128xf32>
    %25 = math.log1p %24 : vector<16x128xf32>
    %cst_6 = arith.constant 0.000000e+00 : f32
    %26 = vector.broadcast %cst_6 : f32 to vector<16x128xf32>
    %27 = arith.maximumf %18, %26 : vector<16x128xf32>
    %28 = arith.mulf %18, %20 : vector<16x128xf32>
    %29 = arith.subf %27, %28 : vector<16x128xf32>
    %30 = arith.addf %29, %25 : vector<16x128xf32>
    %cst_7 = arith.constant 0.000000e+00 : f32
    %31 = vector.broadcast %cst_7 : f32 to vector<16x128xf32>
    %32 = arith.subf %31, %18 : vector<16x128xf32>
    %cst_8 = arith.constant 2.000000e+00 : f32
    %33 = vector.broadcast %cst_8 : f32 to vector<16x128xf32>
    %34 = arith.mulf %20, %33 : vector<16x128xf32>
    %cst_9 = arith.constant 1.000000e+00 : f32
    %35 = vector.broadcast %cst_9 : f32 to vector<16x128xf32>
    %36 = arith.subf %34, %35 : vector<16x128xf32>
    %37 = arith.mulf %32, %36 : vector<16x128xf32>
    %cst_10 = arith.constant 0.000000e+00 : f32
    %38 = vector.broadcast %cst_10 : f32 to vector<16x128xf32>
    %39 = arith.minimumf %37, %38 : vector<16x128xf32>
    %40 = math.absf %37 : vector<16x128xf32>
    %cst_11 = arith.constant 0.000000e+00 : f32
    %41 = vector.broadcast %cst_11 : f32 to vector<16x128xf32>
    %42 = arith.subf %41, %40 : vector<16x128xf32>
    %43 = math.exp %42 : vector<16x128xf32>
    %44 = math.log1p %43 : vector<16x128xf32>
    %45 = arith.subf %39, %44 : vector<16x128xf32>
    %cst_12 = arith.constant 2.000000e+00 : f32
    %46 = vector.broadcast %cst_12 : f32 to vector<16x128xf32>
    %47 = arith.mulf %45, %46 : vector<16x128xf32>
    %48 = math.exp %47 : vector<16x128xf32>
    %49 = arith.mulf %48, %30 : vector<16x128xf32>
    %cst_13 = arith.constant 0.000000e+00 : f32
    %50 = vector.broadcast %cst_13 : f32 to vector<16x128xf32>
    %51 = arith.cmpf oge, %18, %50 : vector<16x128xf32>
    %cst_14 = arith.constant 1.000000e+00 : f32
    %52 = vector.broadcast %cst_14 : f32 to vector<16x128xf32>
    %53 = arith.select %51, %52, %24 : vector<16x128xi1>, vector<16x128xf32>
    %cst_15 = arith.constant 1.000000e+00 : f32
    %54 = vector.broadcast %cst_15 : f32 to vector<16x128xf32>
    %55 = arith.addf %54, %24 : vector<16x128xf32>
    %56 = arith.divf %53, %55 : vector<16x128xf32>
    %cst_16 = arith.constant 0.000000e+00 : f32
    %57 = vector.broadcast %cst_16 : f32 to vector<16x128xf32>
    %58 = arith.select %16, %49, %57 : vector<16x128xi1>, vector<16x128xf32>
    %59 = arith.mulf %56, %20 : vector<16x128xf32>
    %cst_17 = arith.constant 0.000000e+00 : f32
    %60 = vector.broadcast %cst_17 : f32 to vector<16x128xf32>
    %61 = arith.select %16, %56, %60 : vector<16x128xi1>, vector<16x128xf32>
    %c0_18 = arith.constant 0 : index
    %c0_19 = arith.constant 0 : index
    %62 = vector.load %arg4[%c0_18, %c0_19] : memref<32x128xf32, #tpu.memory_space<vmem>>, vector<8x128xf32>
    %63 = vector.shape_cast %58 : vector<16x128xf32> to vector<2x8x128xf32>
    %cst_20 = arith.constant dense<0.000000e+00> : vector<8x128xf32>
    %64 = vector.multi_reduction <add>, %63, %cst_20 [0] : vector<2x8x128xf32> to vector<8x128xf32>
    %65 = arith.addf %62, %64 : vector<8x128xf32>
    %c0_21 = arith.constant 0 : index
    %c0_22 = arith.constant 0 : index
    %66 = vector.load %arg4[%c0_21, %c0_22] : memref<32x128xf32, #tpu.memory_space<vmem>>, vector<8x128xf32>
    tpu.vector_store %arg4[%c0_21, %c0_22], %65 {strides = array<i32>} : memref<32x128xf32, #tpu.memory_space<vmem>>, vector<8x128xf32>,
    %c8 = arith.constant 8 : index
    %c0_23 = arith.constant 0 : index
    %67 = vector.load %arg4[%c8, %c0_23] : memref<32x128xf32, #tpu.memory_space<vmem>>, vector<8x128xf32>
    %68 = vector.shape_cast %59 : vector<16x128xf32> to vector<2x8x128xf32>
    %cst_24 = arith.constant dense<0.000000e+00> : vector<8x128xf32>
    %69 = vector.multi_reduction <add>, %68, %cst_24 [0] : vector<2x8x128xf32> to vector<8x128xf32>
    %70 = arith.addf %67, %69 : vector<8x128xf32>
    %c8_25 = arith.constant 8 : index
    %c0_26 = arith.constant 0 : index
    %71 = vector.load %arg4[%c8_25, %c0_26] : memref<32x128xf32, #tpu.memory_space<vmem>>, vector<8x128xf32>
    tpu.vector_store %arg4[%c8_25, %c0_26], %70 {strides = array<i32>} : memref<32x128xf32, #tpu.memory_space<vmem>>, vector<8x128xf32>,
    %c16 = arith.constant 16 : index
    %c0_27 = arith.constant 0 : index
    %72 = vector.load %arg4[%c16, %c0_27] : memref<32x128xf32, #tpu.memory_space<vmem>>, vector<8x128xf32>
    %73 = vector.shape_cast %61 : vector<16x128xf32> to vector<2x8x128xf32>
    %cst_28 = arith.constant dense<0.000000e+00> : vector<8x128xf32>
    %74 = vector.multi_reduction <add>, %73, %cst_28 [0] : vector<2x8x128xf32> to vector<8x128xf32>
    %75 = arith.addf %72, %74 : vector<8x128xf32>
    %c16_29 = arith.constant 16 : index
    %c0_30 = arith.constant 0 : index
    %76 = vector.load %arg4[%c16_29, %c0_30] : memref<32x128xf32, #tpu.memory_space<vmem>>, vector<8x128xf32>
    tpu.vector_store %arg4[%c16_29, %c0_30], %75 {strides = array<i32>} : memref<32x128xf32, #tpu.memory_space<vmem>>, vector<8x128xf32>,
    %c24 = arith.constant 24 : index
    %c0_31 = arith.constant 0 : index
    %77 = vector.load %arg4[%c24, %c0_31] : memref<32x128xf32, #tpu.memory_space<vmem>>, vector<8x128xf32>
    %78 = vector.shape_cast %20 : vector<16x128xf32> to vector<2x8x128xf32>
    %cst_32 = arith.constant dense<0.000000e+00> : vector<8x128xf32>
    %79 = vector.multi_reduction <add>, %78, %cst_32 [0] : vector<2x8x128xf32> to vector<8x128xf32>
    %80 = arith.addf %77, %79 : vector<8x128xf32>
    %c24_33 = arith.constant 24 : index
    %c0_34 = arith.constant 0 : index
    %81 = vector.load %arg4[%c24_33, %c0_34] : memref<32x128xf32, #tpu.memory_space<vmem>>, vector<8x128xf32>
    tpu.vector_store %arg4[%c24_33, %c0_34], %80 {strides = array<i32>} : memref<32x128xf32, #tpu.memory_space<vmem>>, vector<8x128xf32>,
    return
  }
  func.func @transform_0(%arg0: i32, %arg1: i32) -> (i32, i32) {
    %c1_i32 = arith.constant 1 : i32
    %0 = arith.muli %arg0, %c1_i32 : i32
    %1 = arith.addi %0, %arg1 : i32
    %c0_i32 = arith.constant 0 : i32
    %2 = arith.minsi %1, %c0_i32 : i32
    %c0_i32_0 = arith.constant 0 : i32
    %c0_i32_1 = arith.constant 0 : i32
    return %2, %c0_i32_0 : i32, i32
  }
  func.func @transform_1(%arg0: i32, %arg1: i32) -> (i32, i32) {
    %c1_i32 = arith.constant 1 : i32
    %0 = arith.muli %arg0, %c1_i32 : i32
    %1 = arith.addi %0, %arg1 : i32
    %c0_i32 = arith.constant 0 : i32
    %2 = arith.minsi %1, %c0_i32 : i32
    %c0_i32_0 = arith.constant 0 : i32
    %c0_i32_1 = arith.constant 0 : i32
    return %2, %c0_i32_0 : i32, i32
  }
  func.func @transform_2(%arg0: i32, %arg1: i32) -> (i32, i32) {
    %c0_i32 = arith.constant 0 : i32
    %c0_i32_0 = arith.constant 0 : i32
    return %arg0, %c0_i32 : i32, i32
  }
}

</mosaic_0001>

<bundles_post_ra>
// kernel: tpu_custom_call.1
= control target key start
LH: loop header
LB: loop body
LE: loop exit
PB: predicated region body
PF: predicated region fallthrough
CT: control target
= control target key end

     0   :  { %7 = vsyncpa [#allocation3], 0  ;;  %s1127_s0 = inlined_call_operand.hbm [shape: f32[16,128], index: 0, kind: input, shape index: {}]   ;;  %s1128_s1 = inlined_call_operand.hbm [shape: f32[16,128], index: 1, kind: input, shape index: {}]   ;;  %s1129_s2 = inlined_call_operand.hbm [shape: f32[64,128], index: 2, kind: output, shape index: {}]  }
   0x1   :  { %9 = vsyncpa [#allocation3 + $0x1], 0 }
   0x2   :  { %10 = vsyncpa [#allocation6], 0 }
   0x3   :  { %12 = vsyncpa [#allocation6 + $0x1], 0 }
   0x4   :  { %13 = vsyncpa [#allocation4], 0 }
   0x5   :  { %15 = vsyncpa [#allocation4 + $0x1], 0  ;;  %s839_s9 = smov 0   ;;  %s841_s10 = smov 0  }
   0x6   :  { %s843_s11 = smov 0   ;;  %s845_s12 = smov 0  }
   0x7   :  { %s847_s13 = smov 0   ;;  %s849_s14 = smov 0  }
   0x8   :  { %s851_s15 = smov 0   ;;  %s853_s16 = smov 0  }
   0x9 LB: > { %s503_s17 = sadd.s32 4294967295, %s815_s16   ;;  %s504_s18 = sadd.s32 4294967294, %s815_s16   ;;  %s815_s16 = sphi %s853_s16, %s21_s16   ;;  %s811_s15 = sphi %s851_s15, %s1148_s15   ;;  %s807_s14 = sphi %s849_s14, %s1147_s14   ;;  %s803_s13 = sphi %s847_s13, %s1117_s13   ;;  %s799_s12 = sphi %s845_s12, %s1146_s12   ;;  %s795_s11 = sphi %s843_s11, %s1145_s11   ;;  %s791_s10 = sphi %s841_s10, %s1144_s10   ;;  %s787_s9 = sphi %s839_s9, %s1143_s9  }
   0xa   : > { %s33_s19 = sadd.s32 1, %s811_s15  ;;  %p784_p1 = scmp.ne.s32.totalorder %s803_s13, 0 }
   0xb   : > { %p35_p0 = scmp.ge.s32.totalorder %s33_s19, 2  ;;  %p54_p2 = scmp.eq.s32.totalorder %s815_s16, 0 }
   0xc   : > { %p59_p3 = scmp.ne.s32.totalorder %s803_s13, %s799_s12  ;;  %p60_p5 = scmp.eq.s32.totalorder %s503_s17, 0 }
   0xd   : > { %s1150_s19 = smov (%p35_p0, %s33_s19), 0  ;;  %p885_p4 = por %p784_p1, %p54_p2 }
   0xe   : > { %p889_p6 = por %p60_p5, %p59_p3  ;;  %s101_s22 = ssub.s32 %s811_s15, %s1150_s19 }
   0xf   : > { %p102_p7 = scmp.eq.s32.totalorder %s101_s22, 0  ;;  %s104_s23 = sadd.s32 1, %s795_s11 }
  0x10   : > { %s1133_s21 = scalar_select %p889_p6, 1, 0 }
  0x11   : > { %s897_s24 = scalar_select %p102_p7, %s795_s11, %s104_s23  }
  0x12   : > { %p114_p8 = scmp.ne.s32.totalorder %s795_s11, %s791_s10  ;;  %p115_p9 = scmp.eq.s32.totalorder %s503_s17, 1 }
  0x13   : > { %p120_p10 = scmp.ne.s32.totalorder %s791_s10, %s787_s9  ;;  %p121_p11 = scmp.eq.s32.totalorder %s504_s18, 1 }
  0x14   : > { %p903_p12 = por %p115_p9, %p114_p8  ;;  %p545_p1 = scmp.lt.s32.totalorder %s815_s16, 2 }
  0x15   : > { %p908_p0 = por %p121_p11, %p120_p10  ;;  %s817_s27 = smov [#allocation2]  }
  0x16   : > { %s1134_s25 = scalar_select %p903_p12, 1, 0 }
  0x17   : > { %s1135_s26 = scalar_select %p908_p0, 1, 0 }
  0x18   : > { %s155_s28 = sshll.u32 %s817_s27, 4  ;;  %p915_p2 = pnand %p545_p1, %p885_p4  ;;  %s156_s28 = int_to_ptr.vmem [resolvable:$true] %s155_s28 }
  0x19   : > { %s648_s4 = scalar_lea.hbm %s1127_s0, 256 }
  0x1a   : > { %p649_p3 = scmp.ne.s32.totalorder %s1127_s0, %s648_s4  ;;  %p650_p5 = pneg %p915_p2 }
  0x1b   : > { %p655_p8 = scmp.lt.u32.totalorder %s648_s4, %s648_s4  ;;  %p657_p9 = scmp.lt.u32.totalorder %s648_s4, %s1127_s0 }
  0x1c   : > { %p651_p7 = pnand %p650_p5, %p649_p3 }
  0x1d   : > { %p658_p10 = por %p657_p9, %p655_p8 }
  0x1e   : > { %p652_p4 = pneg %p651_p7 }
  0x20   : > { %p659_p11 = pnand %p658_p10, %p652_p4 }
  0x22   : > { %662 = shalt.err (!%p659_p11)
}
  0x23   : > { %s663_s12 = scalar_lea.vmem %s156_s28, 256  ;;  %s670_s17 = scalar_lea.vmem %s156_s28, 512 }
  0x24   : > { %p664_p1 = scmp.ne.s32.totalorder %s156_s28, %s663_s12  ;;  %p671_p12 = scmp.lt.s32.totalorder %s156_s28, %s156_s28 }
  0x25   : > { %p672_p6 = scmp.lt.s32.totalorder %s670_s17, %s663_s12 }
  0x26   : > { %p666_p13 = pnand %p664_p1, %p650_p5 }
  0x27   : > { %p673_p3 = por %p672_p6, %p671_p12 }
  0x28   : > { %p667_p0 = pneg %p666_p13 }
  0x2a   : > { %p674_p7 = pnand %p673_p3, %p667_p0 }
  0x2c   : > { %677 = shalt.err (!%p674_p7)
}
  0x2d   : > { %s818_s18 = smov 128   ;;  %s819_s20 = smov 8  }
  0x2e   : > { %537 = dma.hbm_to_vmem [thread:$0]  (!%p915_p2), %s1127_s0, 256, %s156_s28, [#allocation3], %s818_s18, %s818_s18, %s819_s20  }
  0x2f   : > { %p513_p13 = scmp.ge.s32.totalorder %s815_s16, 1  ;;  %p187_p4 = scmp.lt.s32.totalorder %s815_s16, 3 }
  0x30   : > { %s820_s30 = smov [#allocation5]   ;;  %s678_s6 = scalar_lea.hbm %s1128_s1, 256 }
  0x31   : > { %p946_p8 = pnand %p513_p13, %p187_p4  ;;  %s179_s3 = sshll.u32 %s820_s30, 4  ;;  %s180_s3 = int_to_ptr.vmem [resolvable:$true] %s179_s3 }
  0x32   : > { %p679_p6 = scmp.ne.s32.totalorder %s1128_s1, %s678_s6  ;;  %p685_p9 = scmp.lt.u32.totalorder %s678_s6, %s678_s6 }
  0x33   : > { %s1137_s27 = scalar_select %p946_p8, 1, 0 }
  0x34   : > { %p681_p12 = pnand %p679_p6, %p650_p5  ;;  %p687_p10 = scmp.lt.u32.totalorder %s678_s6, %s1128_s1 }
  0x36   : > { %p682_p0 = pneg %p681_p12  ;;  %p688_p11 = por %p687_p10, %p685_p9 }
  0x38   : > { %p689_p1 = pnand %p688_p11, %p682_p0 }
  0x3a   : > { %692 = shalt.err (!%p689_p1)
}
  0x3b   : > { %s693_s17 = scalar_lea.vmem %s180_s3, 256  ;;  %s700_s22 = scalar_lea.vmem %s180_s3, 512 }
  0x3c   : > { %p694_p3 = scmp.ne.s32.totalorder %s180_s3, %s693_s17  ;;  %p701_p4 = scmp.lt.s32.totalorder %s180_s3, %s180_s3 }
  0x3d   : > { %p702_p8 = scmp.lt.s32.totalorder %s700_s22, %s693_s17 }
  0x3e   : > { %p696_p7 = pnand %p694_p3, %p650_p5 }
  0x3f   : > { %p703_p6 = por %p702_p8, %p701_p4 }
  0x40   : > { %p697_p13 = pneg %p696_p7 }
  0x42   : > { %p704_p12 = pnand %p703_p6, %p697_p13 }
  0x44   : > { %707 = shalt.err (!%p704_p12)
}
  0x45   : > { %540 = dma.hbm_to_vmem [thread:$0]  (!%p915_p2), %s1128_s1, 256, %s180_s3, [#allocation6], %s818_s18, %s818_s18, %s819_s20  }
  0x46   : > { %p1138_p0 = scmp.ne.s32.totalorder %s1137_s27, 0 }
  0x47   : > { %s193_s4 = sand.u32 (!%p1138_p0), 1, %s803_s13   ;;  %p1139_p5 = scmp.ne.s32.totalorder (!%p1138_p0), %s1133_s21, 0 }
  0x48   : > { %191 = sbr.rel (%p1138_p0) target bundleno = 172 (0xac), region = 28  ;;  %s514_s5 = sshll.u32 (!%p1138_p0), %s193_s4, 4 }
  0x49   : > { %s194_s6 = scalar_lea.sflag (!%p1138_p0), [#allocation3], %s193_s4  ;;  %s197_s7 = scalar_lea.vmem (!%p1138_p0), [#allocation2], %s514_s5 }
  0x4f   : > { %773 = dma.done.wait (%p1139_p5), %s194_s6, 256  }
  0x50   : > { %775 = vsyncadd (%p1139_p5), %s194_s6, 4294967040  ;;  %s203_s29 = scalar_lea.sflag [#allocation6], %s193_s4  ;;  %s206_s8 = scalar_lea.vmem [#allocation5], %s514_s5 }
  0x51   : > { %777 = dma.done.wait (%p1139_p5), %s203_s29, 256  }
  0x52   : > { %779 = vsyncadd (%p1139_p5), %s203_s29, 4294967040  ;;  %s517_s18 = sshll.u32 %s807_s14, 4  ;;  %v255_v0 = vlaneseq  ;;  %v251_v8 = vld [vmem:[%s197_s7] sm:$0xff]  ;;  %v252_v12 = vld [vmem:[%s197_s7 + $0x8] sm:$0xff]  ;;  %s229_s21 = sand.u32 1, %s791_s10  }
  0x53   : > { %v260_v1 = vstv %s517_s18  ;;  %v253_v9 = vld [vmem:[%s206_s8] sm:$0xff]  ;;  %v254_v13 = vld [vmem:[%s206_s8 + $0x8] sm:$0xff]  ;;  %s516_s20 = sshll.u32 %s229_s21, 5  ;;  %s527_s3 = sshll.u32 %s807_s14, 9 }
  0x54   : > { %v256_v2 = vshrl.u32 %v255_v0, 7  ;;  %v259_v4 = vand.u32 127, %v255_v0  ;;  %s1024_s27 = scalar_lea.vmem [#allocation7], %s516_s20  ;;  %s1068_s22 = scalar_lea.hbm %s1129_s2, %s527_s3 }
  0x55   : > { %s399_s28 = sshll.u32 %s1024_s27, 4  ;;  %s1075_s23 = scalar_lea.sflag [#allocation4], %s229_s21  ;;  %s1070_s28 = int_to_ptr.vmem [resolvable:$true] %s399_s28 }
  0x56   : > { %v257_v3 = vadd.s32 8, %v256_v2  ;;  %v261_v5 = vadd.s32 %v260_v1, %v256_v2  ;;  %s708_s14 = scalar_lea.vmem %s1070_s28, 512  ;;  %p1140_p8 = scmp.ne.s32.totalorder %s1134_s25, 0 }
  0x57   : > { %p709_p2 = scmp.ne.s32.totalorder %s1070_s28, %s708_s14  ;;  %s821_s30 = smov [#allocation7]  }
  0x58   : > { %v262_v6 = vadd.s32 %v260_v1, %v257_v3  ;;  %v263_v7 = vmul.u32 128, %v261_v5  ;;  %s712_s4 = sshll.u32 %s821_s30, 4  ;;  %s713_s4 = int_to_ptr.vmem [resolvable:$false] %s712_s4 }
  0x59   : > { %p710_p9 = pnand %p709_p2, %p1140_p8  ;;  %s714_s5 = scalar_lea.vmem %s713_s4, 1024 }
  0x5a   : > { %v264_v10 = vmul.u32 128, %v262_v6  ;;  %v985_v11 = vadd.s32 %v263_v7, %v259_v4  ;;  %p715_p11 = scmp.lt.s32.totalorder %s1070_s28, %s713_s4  ;;  %p716_p1 = scmp.lt.s32.totalorder %s714_s5, %s708_s14 }
  0x5b   : > { %p711_p10 = pneg %p710_p9 }
  0x5c   : > { %v987_v14 = vadd.s32 %v264_v10, %v259_v4  ;;  %vm267_vm0 = vcmp.lt.s32.totalorder %v985_v11, 2048  ;;  %p717_p3 = por %p716_p1, %p715_p11 }
  0x5d   : > { %v992_v15 = vsel %vm267_vm0, %v251_v8, 0.0  ;;  %v996_v16 = vsel %vm267_vm0, %v253_v9, 0.0 }
  0x5e   : > { %vm268_vm1 = vcmp.lt.s32.totalorder %v987_v14, 2048  ;;  %v273_v17 = vand.u32 2147483647, %v992_v15  ;;  %v307_v20 = vsub.f32 0.0, %v992_v15  ;;  %v309_v21 = vmul.f32 2.0, %v996_v16  ;;  %p718_p7 = pnand %p717_p3, %p711_p10 }
  0x5f   : > { %v1003_v18 = vsel %vm268_vm1, %v252_v12, 0.0  ;;  %v1007_v19 = vsel %vm268_vm1, %v254_v13, 0.0  ;;  %vm353_vm2 = vcmp.ge.f32.partialorder %v992_v15, 0.0 }
  0x60   : > { %v274_v22 = vand.u32 2147483647, %v1003_v18  ;;  %v275_v23 = vsub.f32 0.0, %v273_v17  ;;  %v308_v24 = vsub.f32 0.0, %v1003_v18  ;;  %v310_v25 = vmul.f32 2.0, %v1007_v19 }
  0x61   : > { %v518_v26 = vadd.f32 -1.0, %v309_v21  ;;  %v382_v31 = vadd.f32 %v1007_v19, %v996_v16  ;;  %vm354_vm3 = vcmp.ge.f32.partialorder %v1003_v18, 0.0 }
  0x62   : > { %v276_v27 = vsub.f32 0.0, %v274_v22  ;;  %v277_v28 = vmul.f32 1.442695, %v275_v23  ;;  %v519_v29 = vadd.f32 -1.0, %v310_v25 }
  0x63   : > { %v1016_v30 = vmul.f32 %v518_v26, %v307_v20  ;;  %384 = vst [vmem:[%s1024_s27 + $0x18] sm:$0xff] %v382_v31  ;;  %v299_v31 = vmax.f32 %v992_v15, 0.0 }
  0x64   : > { %624 = vpow2.f32 %v277_v28  ;;  %v279_v32 = vmul.f32 1.442695, %v276_v27  ;;  %v1020_v33 = vmul.f32 %v519_v29, %v308_v24 }
  0x65   : > { %v317_v34 = vand.u32 2147483647, %v1016_v30  ;;  %v315_v2 = vmin.f32 %v1016_v30, 0.0 }
  0x66   : > { %626 = vpow2.f32 %v279_v32  ;;  %v318_v35 = vand.u32 2147483647, %v1020_v33  ;;  %v316_v9 = vmin.f32 %v1020_v33, 0.0  ;;  %v301_v32 = vmul.f32 %v996_v16, %v992_v15 }
  0x67   : > { %v319_v36 = vsub.f32 0.0, %v317_v34 }
  0x68   : > { %v320_v37 = vsub.f32 0.0, %v318_v35 }
  0x69   : > { %v321_v38 = vmul.f32 1.442695, %v319_v36  ;;  %v300_v36 = vmax.f32 %v1003_v18, 0.0 }
  0x6a   : > { %v323_v39 = vmul.f32 1.442695, %v320_v37  ;;  %v302_v37 = vmul.f32 %v1007_v19, %v1003_v18 }
  0x6b   : > { %628 = vpow2.f32 %v321_v38 }
  0x6c   : > { %630 = vpow2.f32 %v323_v39 }
  0x6e   : > { %v1027_v40 = vpop.eup %624 }
  0x6f   : > { %v281_v42 = vadd.f32 1.0, %v1027_v40  ;;  %v355_v49 = vsel %vm353_vm2, 1.0, %v1027_v40  ;;  %v284_v8 = vmul.f32 -0.5, %v1027_v40  ;;  %v287_v25 = vand.u32 2147483647, %v1027_v40 }
  0x70   : > { %v1029_v41 = vpop.eup %626 }
  0x71   : > { %v290_v43 = vadd.f32 1.0, %v1029_v41  ;;  %632 = vrcp.f32 %v281_v42  ;;  %v356_v52 = vsel %vm354_vm3, 1.0, %v1029_v41  ;;  %v293_v13 = vmul.f32 -0.5, %v1029_v41 }
  0x72   : > { %v285_v22 = vadd.f32 1.0, %v284_v8  ;;  %v296_v30 = vand.u32 2147483647, %v1029_v41  ;;  %vm288_vm6 = vcmp.lt.f32.partialorder %v287_v25, 0.0004427343 }
  0x73   : > { %634 = vrcp.f32 %v290_v43  ;;  %v294_v26 = vadd.f32 1.0, %v293_v13 }
  0x74   : > { %v286_v34 = vmul.f32 %v1027_v40, %v285_v22  ;;  %vm297_vm7 = vcmp.lt.f32.partialorder %v296_v30, 0.0004427343 }
  0x75   : > { %v629_v44 = vpop.eup %628  ;;  %v295_v39 = vmul.f32 %v1029_v41, %v294_v26 }
  0x76   : > { %v325_v45 = vadd.f32 1.0, %v629_v44  ;;  %v631_v46 = vpop.eup %630  ;;  %v328_v48 = vmul.f32 -0.5, %v629_v44  ;;  %v331_v56 = vand.u32 2147483647, %v629_v44 }
  0x77   : > { %v334_v47 = vadd.f32 1.0, %v631_v46  ;;  %v337_v50 = vmul.f32 -0.5, %v631_v46  ;;  %v340_v61 = vand.u32 2147483647, %v631_v46 }
  0x78   : > { %636 = vlog2.f32 %v325_v45  ;;  %v329_v53 = vadd.f32 1.0, %v328_v48  ;;  %vm332_vm4 = vcmp.lt.f32.partialorder %v331_v56, 0.0004427343 }
  0x79   : > { %638 = vlog2.f32 %v334_v47  ;;  %v338_v57 = vadd.f32 1.0, %v337_v50  ;;  %vm341_vm5 = vcmp.lt.f32.partialorder %v340_v61, 0.0004427343 }
  0x7a   : > { %640 = vlog2.f32 %v281_v42  ;;  %v330_v62 = vmul.f32 %v629_v44, %v329_v53  ;;  %v303_v42 = vsub.f32 %v299_v31, %v301_v32 }
  0x7b   : > { %v633_v51 = vpop.eup %632  ;;  %642 = vlog2.f32 %v290_v43  ;;  %v339_v5 = vmul.f32 %v631_v46, %v338_v57 }
  0x7c   : > { %v360_v54 = vmul.f32 %v633_v51, %v355_v49 }
  0x7d   : > { %v635_v55 = vpop.eup %634 }
  0x7e   : > { %v362_v58 = vmul.f32 %v635_v55, %v356_v52  ;;  %v365_v59 = vmul.f32 %v360_v54, %v996_v16  ;;  %v367_v60 = vsel %vm267_vm0, %v360_v54, 0.0  ;;  %v304_v16 = vsub.f32 %v300_v36, %v302_v37 }
  0x80   : > { %v366_v63 = vmul.f32 %v362_v58, %v1007_v19  ;;  %v368_v0 = vsel %vm268_vm1, %v362_v58, 0.0 }
  0x81   : > { %v378_v3 = vadd.f32 %v368_v0, %v367_v60 }
  0x82   : > { %v637_v1 = vpop.eup %636  ;;  %v374_v6 = vadd.f32 %v366_v63, %v365_v59 }
  0x83   : > { %v327_v4 = vmul.f32 0.6931472, %v637_v1  ;;  %v639_v7 = vpop.eup %638  ;;  %380 = vst [vmem:[%s1024_s27 + $0x10] sm:$0xff] %v378_v3 }
  0x84   : > { %v336_v12 = vmul.f32 0.6931472, %v639_v7  ;;  %376 = vst [vmem:[%s1024_s27 + $0x8] sm:$0xff] %v374_v6  ;;  %v641_v21 = vpop.eup %640 }
  0x85   : > { %v333_v10 = vsel %vm332_vm4, %v330_v62, %v327_v4  ;;  %v643_v29 = vpop.eup %642  ;;  %v283_v33 = vmul.f32 0.6931472, %v641_v21 }
  0x86   : > { %v343_v17 = vsub.f32 %v315_v2, %v333_v10  ;;  %v342_v20 = vsel %vm341_vm5, %v339_v5, %v336_v12  ;;  %v292_v38 = vmul.f32 0.6931472, %v643_v29 }
  0x87   : > { %v344_v23 = vsub.f32 %v316_v9, %v342_v20  ;;  %v289_v15 = vsel %vm288_vm6, %v286_v34, %v283_v33 }
  0x88   : > { %v345_v24 = vmul.f32 2.0, %v343_v17  ;;  %v298_v40 = vsel %vm297_vm7, %v295_v39, %v292_v38  ;;  %v305_v43 = vadd.f32 %v303_v42, %v289_v15 }
  0x89   : > { %v346_v27 = vmul.f32 2.0, %v344_v23  ;;  %v306_v44 = vadd.f32 %v304_v16, %v298_v40 }
  0x8a   : > { %v347_v28 = vmul.f32 1.442695, %v345_v24 }
  0x8b   : > { %v349_v35 = vmul.f32 1.442695, %v346_v27 }
  0x8c   : > { %644 = vpow2.f32 %v347_v28 }
  0x8d   : > { %646 = vpow2.f32 %v349_v35 }
  0x96   : > { %v645_v45 = vpop.eup %644 }
  0x97   : > { %v351_v46 = vmul.f32 %v645_v45, %v305_v43  ;;  %v647_v47 = vpop.eup %646 }
  0x98   : > { %v352_v18 = vmul.f32 %v647_v47, %v306_v44 }
  0x99   : > { %v363_v19 = vsel %vm267_vm0, %v351_v46, 0.0 }
  0x9a   : > { %v364_v41 = vsel %vm268_vm1, %v352_v18, 0.0 }
  0x9b   : > { %v370_v48 = vadd.f32 %v364_v41, %v363_v19 }
  0x9d   : > { %372 = vst [vmem:[%s1024_s27] sm:$0xff] %v370_v48 }
  0x9e   : > { %721 = shalt.err (!%p718_p7)
}
  0x9f   : > { %s722_s6 = scalar_lea.hbm %s1068_s22, 512  ;;  %s726_s8 = scalar_lea.hbm %s1129_s2, 1024 }
  0xa0   : > { %p723_p13 = scmp.ne.s32.totalorder %s1068_s22, %s722_s6  ;;  %p727_p12 = scmp.lt.u32.totalorder %s1068_s22, %s1129_s2 }
  0xa1   : > { %p728_p0 = scmp.lt.u32.totalorder %s726_s8, %s722_s6  ;;  %p730_p2 = scmp.lt.u32.totalorder %s722_s6, %s1068_s22 }
  0xa2   : > { %p724_p4 = pnand %p723_p13, %p1140_p8 }
  0xa3   : > { %p729_p5 = por %p728_p0, %p727_p12 }
  0xa4   : > { %p725_p6 = pneg %p724_p4 }
  0xa5   : > { %p731_p9 = por %p730_p2, %p729_p5 }
  0xa7   : > { %p732_p10 = pnand %p731_p9, %p725_p6 }
  0xa9   : > { %735 = shalt.err (!%p732_p10)
}
  0xaa   : > { %s822_s20 = smov 128   ;;  %s823_s27 = smov 8  }
  0xab   : > { %532 = dma.vmem_to_hbm [thread:$0]  (%p1140_p8), %s1070_s28, 512, %s1068_s22, %s1075_s23, %s822_s20, %s822_s20, %s823_s27  }
  0xac PF: > { %s414_s3 = sand.u32 1, %s787_s9   ;;  %p1141_p11 = scmp.ne.s32.totalorder %s1135_s26, 0 }
  0xad   : > { %p1142_p1 = scmp.ge.s32.totalorder %s815_s16, 2  ;;  %s415_s12 = scalar_lea.sflag [#allocation4], %s414_s3 }
  0xaf   : > { %p542_p3 = pnand %p1142_p1, %p1141_p11 }
  0xb1   : > { %781 = dma.done.wait (!%p542_p3), %s415_s12, 512  }
  0xb2   : > { %783 = vsyncadd (!%p542_p3), %s415_s12, 4294966784  ;;  %s21_s16 = sadd.s32 1, %s815_s16   ;;  %s1143_s9 = smov %s791_s10 }
  0xb3   : > { %p18_p7 = scmp.ge.s32.totalorder %s21_s16, 4   ;;  %s1144_s10 = smov %s795_s11 }
  0xb4   : > { %s1145_s11 = smov %s897_s24  ;;  %s1146_s12 = smov %s803_s13 }
  0xb5   : > { %s1117_s13 = smov 0   ;;  %s1147_s14 = smov %s811_s15 }
  0xb6   : > { %s1148_s15 = smov %s1150_s19  ;;  %20 = sbr.rel (!%p18_p7) target bundleno = 9 (0x9), region = 90 }
  0xbd   :  { %420 = vsyncpa [#allocation3], 1 }
  0xbe   :  { %422 = vsyncpa [#allocation3 + $0x1], 1 }
  0xbf   :  { %423 = vsyncpa [#allocation6], 1 }
  0xc0   :  { %425 = vsyncpa [#allocation6 + $0x1], 1 }
  0xc1   :  { %426 = vsyncpa [#allocation4], 1 }
  0xc2   :  { %428 = vsyncpa [#allocation4 + $0x1], 1 }

</bundles_post_ra>
